<compile_context>
chip_gen: v6e
topology: v6e:2x2x1
jax: 0.10.0
libtpu: 0.0.40
codegen_flags: <defaults>
</compile_context>

<pallas_src>
import functools

import jax
import jax.numpy as jnp
from jax.experimental import pallas as pl
from jax.experimental.pallas import tpu as pltpu


def _round_up(x, m):
    return ((x + m - 1) // m) * m


def _vmem_capacity_bytes():
    try:
        info = pltpu.get_tpu_info()
        cap = getattr(info, "vmem_capacity_bytes", None)
        if cap:
            return int(cap)
    except Exception:
        pass
    return 64 * 1024 * 1024  # conservative fallback (v7x per-TC VMEM)


def _estimate_vmem(bb, tb, H, itemsize):
    """Rough VMEM usage for one (bb, tb) tiling choice."""
    f32 = 4
    Hp = max(H, 128)
    tbp = _round_up(tb, 128)
    return (2 * bb * tb * H * itemsize      # hs block (double-buffered)
            + 2 * bb * Hp * itemsize        # h_t block (double-buffered)
            + 2 * bb * Hp * itemsize        # out block (double-buffered)
            + 3 * H * H * itemsize          # weights (single-buffered)
            + 2 * bb * Hp * f32             # v / acc scratch
            + 2 * bb * 128 * f32            # m / l scratch (lane padded)
            + 2 * bb * tb * H * itemsize    # chunk-sized product temporaries
            + 3 * bb * tbp * f32)           # score / p temporaries


def _choose_blocks(B, T, H, itemsize, budget_bytes, block_b, block_t=None):
    bb_cap = max(8, _round_up(block_b, 8))
    bb = min(bb_cap, _round_up(B, 8))
    if B > 8:
        # Keep >= 2 batch blocks so the "parallel" axis can shard across
        # TensorCores (v7x megacore) and block DMA overlaps compute.
        bb = min(bb, max(8, _round_up(-(-B // 2), 8)))
    tb = _round_up(T, 8)
    if block_t is not None:
        tb = min(tb, max(8, _round_up(block_t, 8)))
    while tb > 8 and 1.3 * _estimate_vmem(bb, tb, H, itemsize) > budget_bytes:
        tb = max(8, _round_up(tb // 2, 8))
    while bb > 8 and 1.3 * _estimate_vmem(bb, tb, H, itemsize) > budget_bytes:
        bb = max(8, _round_up(bb // 2, 8))
    return bb, tb


def _attention_kernel(hs_ref, ht_ref, w1_ref, w2a_ref, w2b_ref, out_ref,
                      v_s, acc_s, m_s, l_s, *, seq_len, t_block, mask_t):
    # hs_ref: (BB, TB, H)  ht_ref: (BB, H)  w*: (H, H)  out: (BB, H)
    t_idx = pl.program_id(1)

    @pl.when(t_idx == 0)
    def _init():
        # v = h_t @ W1 : one full-width MXU matmul per batch block.
        v_s[...] = jnp.dot(ht_ref[...], w1_ref[...],
                           preferred_element_type=jnp.float32)
        m_s[...] = jnp.full_like(m_s, -jnp.inf)
        l_s[...] = jnp.zeros_like(l_s)
        acc_s[...] = jnp.zeros_like(acc_s)

    hs = hs_ref[...]                                  # (BB, TB, H), input dtype
    v = v_s[...].astype(hs.dtype)                     # (BB, H)

    # score[b,t] = sum_h hs[b,t,h] * v[b,h]
    # multiplies in input dtype (bf16 VALU on v6e/v7x), f32 accumulation.
    s = jnp.sum(hs * v[:, None, :], axis=-1, dtype=jnp.float32)   # (BB, TB)

    if mask_t:  # static: only emitted when T was padded up to a multiple of TB
        pos = t_idx * t_block + jax.lax.broadcasted_iota(jnp.int32, s.shape, 1)
        s = jnp.where(pos < seq_len, s, -jnp.inf)

    # Online softmax update (f32).
    m_old = m_s[...]
    m_new = jnp.maximum(m_old, jnp.max(s, axis=-1, keepdims=True))
    alpha = jnp.exp(m_old - m_new)                    # (BB, 1)
    p = jnp.exp(s - m_new)                            # (BB, TB); 0 at padding
    l_s[...] = alpha * l_s[...] + jnp.sum(p, axis=-1, keepdims=True)

    # Unnormalized context accumulation: acc += sum_t p[t] * hs[t].
    pw = p.astype(hs.dtype)
    acc_s[...] = alpha * acc_s[...] + jnp.sum(
        hs * pw[:, :, None], axis=1, dtype=jnp.float32)           # (BB, H)
    m_s[...] = m_new

    @pl.when(t_idx == pl.num_programs(1) - 1)
    def _finalize():
        inv_l = pl.reciprocal(l_s[...], approx=True)  # EUP slot, ~free
        context = (acc_s[...] * inv_l).astype(hs.dtype)
        # tanh(fc2(cat(context, h_t))) == tanh(context @ W2a^T + h_t @ W2b^T)
        # dot_general contracts on the weights' last (in_features) axis, so
        # the transpose is handled by the MXU, not an XLU copy.
        z = jax.lax.dot_general(
            context, w2a_ref[...],
            dimension_numbers=(((1,), (1,)), ((), ())),
            preferred_element_type=jnp.float32)
        z = z + jax.lax.dot_general(
            ht_ref[...], w2b_ref[...],
            dimension_numbers=(((1,), (1,)), ((), ())),
            preferred_element_type=jnp.float32)
        out_ref[...] = jnp.tanh(z).astype(out_ref.dtype)


def lstm_attention_block(hidden_states, w1, w2, *, block_b=256, block_t=None):
    """hidden_states: (B, T, H); w1: (H, H); w2: (H, 2H)  ->  (B, H)."""
    B, T, H = hidden_states.shape
    assert w1.shape == (H, H)
    assert w2.shape == (H, 2 * H)

    act_dtype = hidden_states.dtype
    # bf16 activations + f32 weights -> cast weights (halves weight DMA/VMEM,
    # single-pass bf16 MXU).
    if jnp.dtype(act_dtype).itemsize < jnp.dtype(w1.dtype).itemsize:
        w1 = w1.astype(act_dtype)
        w2 = w2.astype(act_dtype)

    # Split fc2 once wrapper-side: first H in_features act on context,
    # last H on h_t (avoids an in-kernel lane concat).
    w2a = w2[:, :H]
    w2b = w2[:, H:]

    # Real last time step, sliced BEFORE any T padding.
    h_t = hidden_states[:, T - 1, :]

    itemsize = jnp.dtype(act_dtype).itemsize
    cap = _vmem_capacity_bytes()
    budget = max(int(0.45 * cap), 4 * 1024 * 1024)
    BB, TB = _choose_blocks(B, T, H, itemsize, budget, block_b, block_t)

    Bp = _round_up(B, BB)
    Tp = _round_up(T, TB)
    if Bp != B:
        # Zero-padded batch rows give tanh(0)=0 and are sliced off below.
        hidden_states = jnp.pad(hidden_states, ((0, Bp - B), (0, 0), (0, 0)))
        h_t = jnp.pad(h_t, ((0, Bp - B), (0, 0)))
    if Tp != T:
        # Padded time steps are masked to -inf scores inside the kernel.
        hidden_states = jnp.pad(hidden_states, ((0, 0), (0, Tp - T), (0, 0)))

    vmem_limit = int(min(cap, max(budget,
                                  int(1.3 * _estimate_vmem(BB, TB, H, itemsize)))))

    kernel = functools.partial(_attention_kernel, seq_len=T, t_block=TB,
                               mask_t=(Tp != T))

    def _weight_spec():
        # Constant index map + single buffer: loaded once, never re-fetched.
        return pl.BlockSpec((H, H), lambda i, t: (0, 0),
                            pipeline_mode=pl.Buffered(1))

    out = pl.pallas_call(
        kernel,
        out_shape=jax.ShapeDtypeStruct((Bp, H), act_dtype),
        grid_spec=pltpu.PrefetchScalarGridSpec(
            num_scalar_prefetch=0,
            grid=(Bp // BB, Tp // TB),
            in_specs=[
                pl.BlockSpec((BB, TB, H), lambda i, t: (i, t, 0)),
                pl.BlockSpec((BB, H), lambda i, t: (i, 0)),
                _weight_spec(),   # w1
                _weight_spec(),   # w2a (context half)
                _weight_spec(),   # w2b (h_t half)
            ],
            out_specs=pl.BlockSpec((BB, H), lambda i, t: (i, 0)),
            scratch_shapes=[
                pltpu.VMEM((BB, H), jnp.float32),   # v = h_t @ W1
                pltpu.VMEM((BB, H), jnp.float32),   # context accumulator
                pltpu.VMEM((BB, 1), jnp.float32),   # running max
                pltpu.VMEM((BB, 1), jnp.float32),   # running sum
            ],
        ),
        compiler_params=pltpu.CompilerParams(
            dimension_semantics=("parallel", "arbitrary"),
            vmem_limit_bytes=vmem_limit),
    )(hidden_states, h_t, w1, w2a, w2b)

    return out[:B]


def _reference(hidden_states, w1, w2):
    # Pure-JAX mirror of the PyTorch forward (no algebraic rewrite).
    sfp = jnp.einsum("bth,kh->btk", hidden_states, w1)
    h_t = hidden_states[:, -1, :]
    score = jnp.einsum("bth,bh->bt", sfp, h_t)
    aw = jax.nn.softmax(score, axis=1)
    context = jnp.einsum("bth,bt->bh", hidden_states, aw)
    pre = jnp.concatenate([context, h_t], axis=1)
    return jnp.tanh(jnp.einsum("bd,kd->bk", pre, w2))


if __name__ == "__main__":
    key = jax.random.PRNGKey(0)

    def run_case(B, T, H, block_t=None):
        k_x, k_w1, k_w2 = jax.random.split(jax.random.fold_in(key, B * 1000 + T), 3)
        hs = jax.random.normal(k_x, (B, T, H), dtype=jnp.float32)
        bound1 = 1.0 / (H ** 0.5)
        bound2 = 1.0 / ((2 * H) ** 0.5)
        w1 = jax.random.uniform(k_w1, (H, H), jnp.float32, -bound1, bound1)
        w2 = jax.random.uniform(k_w2, (H, 2 * H), jnp.float32, -bound2, bound2)

        out = lstm_attention_block(hs, w1, w2, block_t=block_t)
        out = jax.block_until_ready(out)
        ref = _reference(hs, w1, w2)
        assert out.shape == (B, H)
        # Tolerance accounts for the approx (EUP) reciprocal in the softmax.
        assert jnp.allclose(out, ref, atol=5e-3, rtol=5e-3), (
            float(jnp.max(jnp.abs(out - ref))))

    # Primary small case (single T step).
    run_case(2, 8, 32)
    # Exercise the streamed-T / online-softmax / masking / multi-block path.
    run_case(10, 20, 32, block_t=8)

    print("KERNEL_OK")
</pallas_src>

<mosaic_0001>
module attributes {stable_mosaic.version = 11 : i64} {
  func.func @_attention_kernel(%arg0: i32, %arg1: i32, %arg2: memref<8x8x32xf32, #tpu.memory_space<vmem>>, %arg3: memref<8x32xf32, #tpu.memory_space<vmem>>, %arg4: memref<32x32xf32, #tpu.memory_space<vmem>>, %arg5: memref<32x32xf32, #tpu.memory_space<vmem>>, %arg6: memref<32x32xf32, #tpu.memory_space<vmem>>, %arg7: memref<8x32xf32, #tpu.memory_space<vmem>>, %arg8: memref<8x32xf32, #tpu.memory_space<vmem>>, %arg9: memref<8x32xf32, #tpu.memory_space<vmem>>, %arg10: memref<8x1xf32, #tpu.memory_space<vmem>>, %arg11: memref<8x1xf32, #tpu.memory_space<vmem>>) attributes {dimension_semantics = [#tpu.dimension_semantics<parallel>, #tpu.dimension_semantics<arbitrary>], iteration_bounds = array<i64: 1, 1>, scalar_prefetch = 0 : i64, scratch_operands = 4 : i64, tpu.core_type = #tpu.core_type<tc>, window_params = [{transform_indices = @transform_0, window_bounds = array<i64: 8, 8, 32>}, {transform_indices = @transform_1, window_bounds = array<i64: 8, 32>}, {pipeline_mode = #tpu.pipeline_mode<synchronous>, transform_indices = @transform_2, window_bounds = array<i64: 32, 32>}, {pipeline_mode = #tpu.pipeline_mode<synchronous>, transform_indices = @transform_3, window_bounds = array<i64: 32, 32>}, {pipeline_mode = #tpu.pipeline_mode<synchronous>, transform_indices = @transform_4, window_bounds = array<i64: 32, 32>}, {transform_indices = @transform_5, window_bounds = array<i64: 8, 32>}]} {
    %c0_i32 = arith.constant 0 : i32
    %0 = arith.cmpi eq, %arg1, %c0_i32 : i32
    %1 = arith.extui %0 : i1 to i32
    %c0_i32_0 = arith.constant 0 : i32
    %2 = arith.cmpi ne, %1, %c0_i32_0 : i32
    scf.if %2 {
      %c0_22 = arith.constant 0 : index
      %c0_23 = arith.constant 0 : index
      %37 = vector.load %arg3[%c0_22, %c0_23] : memref<8x32xf32, #tpu.memory_space<vmem>>, vector<8x32xf32>
      %c0_24 = arith.constant 0 : index
      %c0_25 = arith.constant 0 : index
      %38 = vector.load %arg4[%c0_24, %c0_25] : memref<32x32xf32, #tpu.memory_space<vmem>>, vector<32x32xf32>
      %cst_26 = arith.constant dense<0.000000e+00> : vector<8x32xf32>
      %39 = tpu.matmul %37, %38, %cst_26 {dimension_numbers = #tpu.dot_dimension_numbers<[1], [0], [0], [1], [0, 0, 1, 1], [], []>} : vector<8x32xf32>, vector<32x32xf32>, vector<8x32xf32> -> vector<8x32xf32>
      %c0_27 = arith.constant 0 : index
      %c0_28 = arith.constant 0 : index
      %40 = vector.load %arg8[%c0_27, %c0_28] : memref<8x32xf32, #tpu.memory_space<vmem>>, vector<8x32xf32>
      tpu.vector_store %arg8[%c0_27, %c0_28], %39 {strides = array<i32>} : memref<8x32xf32, #tpu.memory_space<vmem>>, vector<8x32xf32>,
      %cst_29 = arith.constant 0xFF800000 : f32
      %41 = vector.broadcast %cst_29 : f32 to vector<8x1xf32>
      %c0_30 = arith.constant 0 : index
      %c0_31 = arith.constant 0 : index
      %42 = vector.load %arg10[%c0_30, %c0_31] : memref<8x1xf32, #tpu.memory_space<vmem>>, vector<8x1xf32>
      tpu.vector_store %arg10[%c0_30, %c0_31], %41 {strides = array<i32>} : memref<8x1xf32, #tpu.memory_space<vmem>>, vector<8x1xf32>,
      %cst_32 = arith.constant 0.000000e+00 : f32
      %43 = vector.broadcast %cst_32 : f32 to vector<8x1xf32>
      %c0_33 = arith.constant 0 : index
      %c0_34 = arith.constant 0 : index
      %44 = vector.load %arg11[%c0_33, %c0_34] : memref<8x1xf32, #tpu.memory_space<vmem>>, vector<8x1xf32>
      tpu.vector_store %arg11[%c0_33, %c0_34], %43 {strides = array<i32>} : memref<8x1xf32, #tpu.memory_space<vmem>>, vector<8x1xf32>,
      %cst_35 = arith.constant 0.000000e+00 : f32
      %45 = vector.broadcast %cst_35 : f32 to vector<8x32xf32>
      %c0_36 = arith.constant 0 : index
      %c0_37 = arith.constant 0 : index
      %46 = vector.load %arg9[%c0_36, %c0_37] : memref<8x32xf32, #tpu.memory_space<vmem>>, vector<8x32xf32>
      tpu.vector_store %arg9[%c0_36, %c0_37], %45 {strides = array<i32>} : memref<8x32xf32, #tpu.memory_space<vmem>>, vector<8x32xf32>,
    } else {
    }
    %c0 = arith.constant 0 : index
    %c0_1 = arith.constant 0 : index
    %c0_2 = arith.constant 0 : index
    %3 = vector.load %arg2[%c0, %c0_1, %c0_2] : memref<8x8x32xf32, #tpu.memory_space<vmem>>, vector<8x8x32xf32>
    %c0_3 = arith.constant 0 : index
    %c0_4 = arith.constant 0 : index
    %4 = vector.load %arg8[%c0_3, %c0_4] : memref<8x32xf32, #tpu.memory_space<vmem>>, vector<8x32xf32>
    %5 = vector.shape_cast %4 : vector<8x32xf32> to vector<8x1x32xf32>
    %6 = vector.broadcast %5 : vector<8x1x32xf32> to vector<8x8x32xf32>
    %7 = arith.mulf %3, %6 : vector<8x8x32xf32>
    %cst = arith.constant dense<0.000000e+00> : vector<8x8xf32>
    %8 = vector.multi_reduction <add>, %7, %cst [2] : vector<8x8x32xf32> to vector<8x8xf32>
    %c0_5 = arith.constant 0 : index
    %c0_6 = arith.constant 0 : index
    %9 = vector.load %arg10[%c0_5, %c0_6] : memref<8x1xf32, #tpu.memory_space<vmem>>, vector<8x1xf32>
    %cst_7 = arith.constant dense<0xFF800000> : vector<8xf32>
    %10 = vector.multi_reduction <maximumf>, %8, %cst_7 [1] : vector<8x8xf32> to vector<8xf32>
    %11 = vector.shape_cast %10 : vector<8xf32> to vector<8x1xf32>
    %12 = arith.maximumf %9, %11 : vector<8x1xf32>
    %13 = arith.subf %9, %12 : vector<8x1xf32>
    %14 = math.exp %13 : vector<8x1xf32>
    %15 = vector.broadcast %12 : vector<8x1xf32> to vector<8x8xf32>
    %16 = arith.subf %8, %15 : vector<8x8xf32>
    %17 = math.exp %16 : vector<8x8xf32>
    %c0_8 = arith.constant 0 : index
    %c0_9 = arith.constant 0 : index
    %18 = vector.load %arg11[%c0_8, %c0_9] : memref<8x1xf32, #tpu.memory_space<vmem>>, vector<8x1xf32>
    %19 = arith.mulf %14, %18 : vector<8x1xf32>
    %cst_10 = arith.constant dense<0.000000e+00> : vector<8xf32>
    %20 = vector.multi_reduction <add>, %17, %cst_10 [1] : vector<8x8xf32> to vector<8xf32>
    %21 = vector.shape_cast %20 : vector<8xf32> to vector<8x1xf32>
    %22 = arith.addf %19, %21 : vector<8x1xf32>
    %c0_11 = arith.constant 0 : index
    %c0_12 = arith.constant 0 : index
    %23 = vector.load %arg11[%c0_11, %c0_12] : memref<8x1xf32, #tpu.memory_space<vmem>>, vector<8x1xf32>
    tpu.vector_store %arg11[%c0_11, %c0_12], %22 {strides = array<i32>} : memref<8x1xf32, #tpu.memory_space<vmem>>, vector<8x1xf32>,
    %c0_13 = arith.constant 0 : index
    %c0_14 = arith.constant 0 : index
    %24 = vector.load %arg9[%c0_13, %c0_14] : memref<8x32xf32, #tpu.memory_space<vmem>>, vector<8x32xf32>
    %25 = vector.broadcast %14 : vector<8x1xf32> to vector<8x32xf32>
    %26 = arith.mulf %25, %24 : vector<8x32xf32>
    %27 = vector.shape_cast %17 : vector<8x8xf32> to vector<8x8x1xf32>
    %28 = vector.broadcast %27 : vector<8x8x1xf32> to vector<8x8x32xf32>
    %29 = arith.mulf %3, %28 : vector<8x8x32xf32>
    %cst_15 = arith.constant dense<0.000000e+00> : vector<8x32xf32>
    %30 = vector.multi_reduction <add>, %29, %cst_15 [1] : vector<8x8x32xf32> to vector<8x32xf32>
    %31 = arith.addf %26, %30 : vector<8x32xf32>
    %c0_16 = arith.constant 0 : index
    %c0_17 = arith.constant 0 : index
    %32 = vector.load %arg9[%c0_16, %c0_17] : memref<8x32xf32, #tpu.memory_space<vmem>>, vector<8x32xf32>
    tpu.vector_store %arg9[%c0_16, %c0_17], %31 {strides = array<i32>} : memref<8x32xf32, #tpu.memory_space<vmem>>, vector<8x32xf32>,
    %c0_18 = arith.constant 0 : index
    %c0_19 = arith.constant 0 : index
    %33 = vector.load %arg10[%c0_18, %c0_19] : memref<8x1xf32, #tpu.memory_space<vmem>>, vector<8x1xf32>
    tpu.vector_store %arg10[%c0_18, %c0_19], %12 {strides = array<i32>} : memref<8x1xf32, #tpu.memory_space<vmem>>, vector<8x1xf32>,
    %c0_i32_20 = arith.constant 0 : i32
    %34 = arith.cmpi eq, %arg1, %c0_i32_20 : i32
    %35 = arith.extui %34 : i1 to i32
    %c0_i32_21 = arith.constant 0 : i32
    %36 = arith.cmpi ne, %35, %c0_i32_21 : i32
    scf.if %36 {
      %c0_22 = arith.constant 0 : index
      %c0_23 = arith.constant 0 : index
      %37 = vector.load %arg11[%c0_22, %c0_23] : memref<8x1xf32, #tpu.memory_space<vmem>>, vector<8x1xf32>
      %38 = tpu.reciprocal %37 {approx = true} : vector<8x1xf32> -> vector<8x1xf32>
      %c0_24 = arith.constant 0 : index
      %c0_25 = arith.constant 0 : index
      %39 = vector.load %arg9[%c0_24, %c0_25] : memref<8x32xf32, #tpu.memory_space<vmem>>, vector<8x32xf32>
      %40 = vector.broadcast %38 : vector<8x1xf32> to vector<8x32xf32>
      %41 = arith.mulf %39, %40 : vector<8x32xf32>
      %c0_26 = arith.constant 0 : index
      %c0_27 = arith.constant 0 : index
      %42 = vector.load %arg5[%c0_26, %c0_27] : memref<32x32xf32, #tpu.memory_space<vmem>>, vector<32x32xf32>
      %cst_28 = arith.constant dense<0.000000e+00> : vector<8x32xf32>
      %43 = tpu.matmul %41, %42, %cst_28 {dimension_numbers = #tpu.dot_dimension_numbers<[1], [1], [0], [0], [0, 0, 1, 0], [], []>} : vector<8x32xf32>, vector<32x32xf32>, vector<8x32xf32> -> vector<8x32xf32>
      %c0_29 = arith.constant 0 : index
      %c0_30 = arith.constant 0 : index
      %44 = vector.load %arg3[%c0_29, %c0_30] : memref<8x32xf32, #tpu.memory_space<vmem>>, vector<8x32xf32>
      %c0_31 = arith.constant 0 : index
      %c0_32 = arith.constant 0 : index
      %45 = vector.load %arg6[%c0_31, %c0_32] : memref<32x32xf32, #tpu.memory_space<vmem>>, vector<32x32xf32>
      %cst_33 = arith.constant dense<0.000000e+00> : vector<8x32xf32>
      %46 = tpu.matmul %44, %45, %cst_33 {dimension_numbers = #tpu.dot_dimension_numbers<[1], [1], [0], [0], [0, 0, 1, 0], [], []>} : vector<8x32xf32>, vector<32x32xf32>, vector<8x32xf32> -> vector<8x32xf32>
      %47 = arith.addf %43, %46 : vector<8x32xf32>
      %48 = math.tanh %47 : vector<8x32xf32>
      %c0_34 = arith.constant 0 : index
      %c0_35 = arith.constant 0 : index
      %49 = vector.load %arg7[%c0_34, %c0_35] : memref<8x32xf32, #tpu.memory_space<vmem>>, vector<8x32xf32>
      tpu.vector_store %arg7[%c0_34, %c0_35], %48 {strides = array<i32>} : memref<8x32xf32, #tpu.memory_space<vmem>>, vector<8x32xf32>,
    } else {
    }
    return
  }
  func.func @transform_0(%arg0: i32, %arg1: i32) -> (i32, i32, i32) {
    %c0_i32 = arith.constant 0 : i32
    %c0_i32_0 = arith.constant 0 : i32
    return %arg0, %arg1, %c0_i32 : i32, i32, i32
  }
  func.func @transform_1(%arg0: i32, %arg1: i32) -> (i32, i32) {
    %c0_i32 = arith.constant 0 : i32
    %c0_i32_0 = arith.constant 0 : i32
    return %arg0, %c0_i32 : i32, i32
  }
  func.func @transform_2(%arg0: i32, %arg1: i32) -> (i32, i32) {
    %c0_i32 = arith.constant 0 : i32
    %c0_i32_0 = arith.constant 0 : i32
    %c0_i32_1 = arith.constant 0 : i32
    return %c0_i32, %c0_i32_0 : i32, i32
  }
  func.func @transform_3(%arg0: i32, %arg1: i32) -> (i32, i32) {
    %c0_i32 = arith.constant 0 : i32
    %c0_i32_0 = arith.constant 0 : i32
    %c0_i32_1 = arith.constant 0 : i32
    return %c0_i32, %c0_i32_0 : i32, i32
  }
  func.func @transform_4(%arg0: i32, %arg1: i32) -> (i32, i32) {
    %c0_i32 = arith.constant 0 : i32
    %c0_i32_0 = arith.constant 0 : i32
    %c0_i32_1 = arith.constant 0 : i32
    return %c0_i32, %c0_i32_0 : i32, i32
  }
  func.func @transform_5(%arg0: i32, %arg1: i32) -> (i32, i32) {
    %c0_i32 = arith.constant 0 : i32
    %c0_i32_0 = arith.constant 0 : i32
    return %arg0, %c0_i32 : i32, i32
  }
}

</mosaic_0001>

<bundles_post_ra>
// kernel: tpu_custom_call.1
= control target key start
LH: loop header
LB: loop body
LE: loop exit
PB: predicated region body
PF: predicated region fallthrough
CT: control target
= control target key end

     0   :  { %10 = vsyncpa [#allocation7], 0  ;;  %s1296_s0 = inlined_call_operand.hbm [shape: f32[8,8,32], index: 0, kind: input, shape index: {}]   ;;  %s1297_s1 = inlined_call_operand.hbm [shape: f32[8,32], index: 1, kind: input, shape index: {}]   ;;  %s1298_s2 = inlined_call_operand.hbm [shape: f32[32,32], index: 2, kind: input, shape index: {}]   ;;  %s1299_s3 = inlined_call_operand.hbm [shape: f32[32,32], index: 3, kind: input, shape index: {}]   ;;  %s1300_s4 = inlined_call_operand.hbm [shape: f32[32,32], index: 4, kind: input, shape index: {}]   ;;  %s1301_s5 = inlined_call_operand.hbm [shape: f32[8,32], index: 5, kind: output, shape index: {}]  }
   0x1   :  { %11 = vsyncpa [#allocation10], 0 }
   0x2   :  { %12 = vsyncpa [#allocation13], 0 }
   0x3   :  { %13 = vsyncpa [#allocation8], 0  ;;  %s1054_s18 = smov [#allocation9]  }
   0x4   :  { %s32_s19 = sshll.u32 %s1054_s18, 4  ;;  %s33_s19 = int_to_ptr.vmem [resolvable:$true] %s32_s19 }
   0x5   :  { %s934_s20 = scalar_lea.vmem %s33_s19, 128  ;;  %p939_p1 = scmp.lt.s32.totalorder %s33_s19, %s33_s19 }
   0x6   :  { %p935_p0 = scmp.ne.s32.totalorder %s33_s19, %s934_s20  ;;  %p940_p2 = scmp.lt.s32.totalorder %s934_s20, %s934_s20 }
   0x8   :  { %p941_p3 = por %p940_p2, %p939_p1 }
   0xa   :  { %p942_p4 = pnand %p941_p3, %p935_p0 }
   0xc   :  { %945 = shalt.err (!%p942_p4)
}
   0xd   :  { %35 = dma.hbm_to_vmem [thread:$0]  %s1297_s1, 128, %s33_s19, [#allocation10]  }
   0xe   :  { %s1055_s23 = smov [#allocation12]   ;;  %s1056_s25 = smov [#allocation6]  }
   0xf   :  { %s53_s24 = sshll.u32 %s1055_s23, 4  ;;  %s19_s26 = sshll.u32 %s1056_s25, 4  ;;  %s54_s24 = int_to_ptr.vmem [resolvable:$true] %s53_s24  ;;  %s20_s26 = int_to_ptr.vmem [resolvable:$true] %s19_s26 }
  0x10   :  { %s954_s27 = scalar_lea.vmem %s54_s24, 512  ;;  %p959_p6 = scmp.lt.s32.totalorder %s54_s24, %s54_s24 }
  0x11   :  { %p955_p5 = scmp.ne.s32.totalorder %s54_s24, %s954_s27  ;;  %p960_p7 = scmp.lt.s32.totalorder %s954_s27, %s954_s27 }
  0x13   :  { %p961_p8 = por %p960_p7, %p959_p6 }
  0x15   :  { %p962_p9 = pnand %p961_p8, %p955_p5 }
  0x17   :  { %965 = shalt.err (!%p962_p9)
}
  0x18   :  { %s1057_s28 = smov 128   ;;  %s1058_s29 = smov 8  }
  0x19   :  { %59 = dma.hbm_to_vmem [thread:$0]  %s1299_s3, 512, %s54_s24, [#allocation13], %s1057_s28, %s1057_s28, %s1058_s29  }
  0x1a   :  { %s974_s1 = scalar_lea.vmem %s20_s26, 1024  ;;  %p979_p11 = scmp.lt.s32.totalorder %s20_s26, %s20_s26 }
  0x1b   :  { %p975_p10 = scmp.ne.s32.totalorder %s20_s26, %s974_s1  ;;  %p980_p12 = scmp.lt.s32.totalorder %s974_s1, %s974_s1 }
  0x1d   :  { %p981_p13 = por %p980_p12, %p979_p11 }
  0x1f   :  { %p982_p0 = pnand %p981_p13, %p975_p10 }
  0x21   :  { %985 = shalt.err (!%p982_p0)
}
  0x22   :  { %25 = dma.hbm_to_vmem [thread:$0]  %s1296_s0, 1024, %s20_s26, [#allocation7], %s1057_s28, %s1057_s28, %s1058_s29  }
  0x23   :  { %s1059_s9 = smov [#allocation11]   ;;  %s1060_s11 = smov [#allocation14]  }
  0x24   :  { %s41_s10 = sshll.u32 %s1059_s9, 4  ;;  %s65_s3 = sshll.u32 %s1060_s11, 4  ;;  %s42_s10 = int_to_ptr.vmem [resolvable:$true] %s41_s10  ;;  %s66_s3 = int_to_ptr.vmem [resolvable:$true] %s65_s3 }
  0x25   :  { %s994_s12 = scalar_lea.vmem %s42_s10, 512  ;;  %p999_p2 = scmp.lt.s32.totalorder %s42_s10, %s42_s10 }
  0x26   :  { %p995_p1 = scmp.ne.s32.totalorder %s42_s10, %s994_s12  ;;  %p1000_p3 = scmp.lt.s32.totalorder %s994_s12, %s994_s12 }
  0x28   :  { %p1001_p4 = por %p1000_p3, %p999_p2 }
  0x2a   :  { %p1002_p5 = pnand %p1001_p4, %p995_p1 }
  0x2c   :  { %1005 = shalt.err (!%p1002_p5)
}
  0x2d   :  { %47 = dma.hbm_to_vmem [thread:$0]  %s1298_s2, 512, %s42_s10, [#allocation10], %s1057_s28, %s1057_s28, %s1058_s29  }
  0x2e   :  { %s1014_s0 = scalar_lea.vmem %s66_s3, 512  ;;  %p1019_p7 = scmp.lt.s32.totalorder %s66_s3, %s66_s3 }
  0x2f   :  { %p1015_p6 = scmp.ne.s32.totalorder %s66_s3, %s1014_s0  ;;  %p1020_p8 = scmp.lt.s32.totalorder %s1014_s0, %s1014_s0 }
  0x31   :  { %p1021_p9 = por %p1020_p8, %p1019_p7 }
  0x33   :  { %p1022_p10 = pnand %p1021_p9, %p1015_p6 }
  0x35   :  { %1025 = shalt.err (!%p1022_p10)
}
  0x36   :  { %71 = dma.hbm_to_vmem [thread:$0]  %s1300_s4, 512, %s66_s3, [#allocation13], %s1057_s28, %s1057_s28, %s1058_s29  }
  0x37   :  { %1046 = dma.done.wait [#allocation7], 1024  }
  0x38   :  { %1047 = vsyncadd [#allocation7], 4294966272 }
  0x39   :  { %1048 = dma.done.wait [#allocation10], 640  }
  0x3a   :  { %1049 = vsyncadd [#allocation10], 4294966656 }
  0x3b   :  { %1050 = dma.done.wait [#allocation13], 1024  }
  0x3c   :  { %1051 = vsyncadd [#allocation13], 4294966272  ;;  %vm96_vm0 = vcmask 261120   ;;  %v1061_v0 = vmov 0.0   ;;  %vm1062_vm1 = vmmov 0   ;;  %v95_v1 = vld [vmem:[#allocation11 + $0x18] sm:$0xff]  ;;  %v189_v8 = vlaneseq }
  0x3d   :  { %855 = vmatprep.subr.mxu0 %v1061_v0  ;;  %863 = vmatprep.mubr.msk.f32.mxu0 %vm1062_vm1, %v1061_v0  ;;  %174 = vst.msk [vmem:[#allocation3] sm:$0xff] %vm96_vm0, %v1061_v0  ;;  %v94_v2 = vld [vmem:[#allocation11 + $0x10] sm:$0xff]  ;;  %v93_v3 = vld [vmem:[#allocation11 + $0x8] sm:$0xff]  ;;  %v92_v4 = vld [vmem:[#allocation11] sm:$0xff]  ;;  %v1063_v6 = vmov 1966171168  }
  0x3e   :  { %866 = vmatprep.subr.mxu1 %v1061_v0  ;;  %874 = vmatprep.mubr.msk.f32.mxu1 %vm1062_vm1, %v1061_v0  ;;  %v1134_v5 = vld [vmem:[#allocation9] sm:$0xff]  ;;  %v187_v7 = vunpack.c.l.s4 %v1063_v6  ;;  %v1144_v11 = vshrl.u32 %v189_v8, 7  ;;  %v1153_v26 = vld [vmem:[#allocation6 + $0x10] sm:$0xff]  ;;  %v1155_v27 = vld [vmem:[#allocation6 + $0x8] sm:$0xff]  ;;  %vm171_vm2 = vcmask 7168   ;;  %v1064_v61 = vmov -inf  }
  0x3f   :  { %856 = vmatpush3.msra.mxu0 %v95_v1  ;;  %v1150_v21 = vld [vmem:[#allocation6] sm:$0xff]  ;;  %v1160_v33 = vld [vmem:[#allocation6 + $0x18] sm:$0xff]  ;;  %v1172_v46 = vld [vmem:[#allocation6 + $0x28] sm:$0xff]  ;;  %172 = vst.msk [vmem:[#allocation4] sm:$0xff] %vm171_vm2, %v1064_v61  ;;  %v317_v62 = vand.u32 127, %v189_v8  ;;  %vm350_vm3 = vcmask 1041409  }
  0x40   :  { %857 = vmatprep.subr.mxu0 %v1061_v0  ;;  %v188_v10 = vunpack.c.0.s8 %v187_v7  ;;  %v1148_v16 = vsub.s32 0, %v1144_v11  ;;  %v1167_v41 = vld [vmem:[#allocation6 + $0x20] sm:$0xff]  ;;  %v1177_v50 = vld [vmem:[#allocation6 + $0x30] sm:$0xff]  ;;  %v1182_v54 = vld [vmem:[#allocation6 + $0x38] sm:$0xff]  ;;  %173 = vst.msk [vmem:[#allocation5] sm:$0xff] %vm171_vm2, %v1061_v0  ;;  %vm352_vm4 = vcmask 1042434  }
  0x41   :  { %858 = vmatpush3.msra.mxu0 %v94_v2  ;;  %v1195_v1 = vsub.s32 %v317_v62, %v1144_v11  ;;  %vm354_vm5 = vcmask 1043459   ;;  %vm356_vm6 = vcmask 1044484   ;;  %vm358_vm7 = vcmask 1045509   ;;  %s1066_s2 = smov [#allocation15]  }
  0x42   :  { %859 = vmatprep.subr.mxu0 %v1061_v0  ;;  %v191_v13 = vsub.s32 %v188_v10, %v1144_v11  ;;  %vm360_vm8 = vcmask 1046534   ;;  %vm362_vm9 = vcmask 1047559   ;;  %vm365_vm10 = vcmask 64512   ;;  %s818_s4 = sshll.u32 %s1066_s2, 4  ;;  %s819_s4 = int_to_ptr.vmem [resolvable:$true] %s818_s4 }
  0x43   :  { %860 = vmatpush3.msra.mxu0 %v93_v3  ;;  %s1026_s17 = scalar_lea.vmem %s819_s4, 128  ;;  %p1031_p12 = scmp.lt.s32.totalorder %s819_s4, %s819_s4 }
  0x44   :  { %861 = vmatprep.subr.mxu0 %v1061_v0  ;;  %p1027_p11 = scmp.ne.s32.totalorder %s819_s4, %s1026_s17  ;;  %p1032_p13 = scmp.lt.s32.totalorder %s1026_s17, %s1026_s17 }
  0x45   :  { %862 = vmatpush3.msra.mxu0 %v92_v4 }
  0x46   :  { %864 = vmatmul.mubr.msk.f32.vlgmr.msra.gmra.mxu0 %vm96_vm0, %v1134_v5  ;;  %877 = vmatprep.subr.mxu0 %v1061_v0  ;;  %p1033_p0 = por %p1032_p13, %p1031_p12 }
  0x47   :  { %885 = vmatprep.mubr.msk.f32.mxu0 %vm1062_vm1, %v1061_v0 }
  0x48   :  { %p1034_p1 = pnand %p1033_p0, %p1027_p11 }
 0x106   :  { %v166_v9 = vpop.f32.mrf.mxu0 }
 0x107   :  { %170 = vst.msk [vmem:[#allocation2] sm:$0xff] %vm96_vm0, %v166_v9 }
 0x108   :  { %v865_v12 = vpop.f32.mrf.mxu0 }
 0x10e   :  { %v183_v14 = vld [vmem:[#allocation2] sm:$0xff] }
 0x10f   :  { %v192_v15 = vrot.slane %v183_v14, %v191_v13  ;;  %v185_v17 = vcombine.high %v183_v14, %v183_v14 }
 0x111   :  { %v208_v18 = vrot.slane %v192_v15, %v191_v13  ;;  %v200_v19 = vcombine.high %v192_v15, %v192_v15  ;;  %v199_v20 = vrot.slane %v185_v17, %v191_v13 }
 0x113   :  { %v237_v22 = vrot.slane %v208_v18, %v1148_v16  ;;  %v230_v23 = vcombine.high %v208_v18, %v208_v18  ;;  %v222_v24 = vrot.slane %v200_v19, %v191_v13  ;;  %v215_v25 = vrot.slane %v199_v20, %v191_v13 }
 0x114   :  { %v201_v28 = vcombine.high %v199_v20, %v199_v20 }
 0x115   :  { %v274_v29 = vmul.f32 %v237_v22, %v1150_v21  ;;  %v245_v30 = vrot.slane %v230_v23, %v1148_v16  ;;  %v241_v31 = vrot.slane %v222_v24, %v1148_v16  ;;  %v232_v32 = vcombine.high %v222_v24, %v222_v24 }
 0x116   :  { %v253_v34 = vrot.slane %v215_v25, %v1148_v16  ;;  %v229_v35 = vrot.slane %v201_v28, %v191_v13  ;;  %v231_v36 = vcombine.high %v215_v25, %v215_v25 }
 0x117   :  { %v283_v37 = vsel %vm96_vm0, %v274_v29, 0.0  ;;  %v276_v38 = vmul.f32 %v245_v30, %v1153_v26  ;;  %v275_v39 = vmul.f32 %v241_v31, %v1155_v27  ;;  %v249_v40 = vrot.slane %v232_v32, %v1148_v16  ;;  %v307_v32 = vld [vmem:[#allocation4] sm:$0xff] }
 0x118   :  { %284 = vadd.xlane.f32.xlu0 %v283_v37  ;;  %v257_v44 = vrot.slane %v229_v35, %v1148_v16  ;;  %v233_v45 = vcombine.high %v229_v35, %v229_v35  ;;  %v278_v48 = vmul.f32 %v253_v34, %v1167_v41  ;;  %v261_v49 = vrot.slane %v231_v36, %v1148_v16 }
 0x119   :  { %v289_v42 = vsel %vm96_vm0, %v276_v38, 0.0  ;;  %v277_v43 = vmul.f32 %v249_v40, %v1160_v33  ;;  %v286_v47 = vsel %vm96_vm0, %v275_v39, 0.0  ;;  %v1065_v31 = vmov 0  }
 0x11a   :  { %290 = vadd.xlane.f32.xlu1 %v289_v42  ;;  %v279_v52 = vmul.f32 %v257_v44, %v1172_v46  ;;  %v265_v53 = vrot.slane %v233_v45, %v1148_v16  ;;  %v295_v55 = vsel %vm96_vm0, %v278_v48, 0.0  ;;  %v280_v56 = vmul.f32 %v261_v49, %v1177_v50  ;;  %902 = vset.pattern.permute.xlu0 %v1065_v31 }
 0x11b   :  { %v292_v51 = vsel %vm96_vm0, %v277_v43, 0.0  ;;  %901 = vset.pattern.permute.xlu1 %v1065_v31  ;;  %v383_v37 = vsub.s32 1, %v1144_v11  ;;  %v387_v38 = vsub.s32 2, %v1144_v11  ;;  %v391_v39 = vsub.s32 3, %v1144_v11 }
 0x11c   :  { %287 = vadd.xlane.f32.xlu0 %v286_v47  ;;  %v298_v57 = vsel %vm96_vm0, %v279_v52, 0.0  ;;  %v281_v58 = vmul.f32 %v265_v53, %v1182_v54  ;;  %v301_v59 = vsel %vm96_vm0, %v280_v56, 0.0  ;;  %v395_v48 = vsub.s32 4, %v1144_v11 }
 0x11d   :  { %v399_v56 = vsub.s32 5, %v1144_v11 }
 0x11e   :  { %293 = vadd.xlane.f32.xlu1 %v292_v51  ;;  %v304_v60 = vsel %vm96_vm0, %v281_v58, 0.0 }
 0x120   :  { %296 = vadd.xlane.f32.xlu0 %v295_v55 }
 0x122   :  { %299 = vadd.xlane.f32.xlu1 %v298_v57 }
 0x124   :  { %302 = vadd.xlane.f32.xlu0 %v301_v59 }
 0x126   :  { %305 = vadd.xlane.f32.xlu1 %v304_v60 }
 0x1a1   :  { %v285_v63 = vpop.xlane.xlu0 %284 }
 0x1a2   :  { %v321_v4 = vrot.slane %v285_v63, %v1195_v1 }
 0x1a3   :  { %v291_v2 = vpop.xlane.xlu1 %290 }
 0x1a4   :  { %v329_v7 = vrot.slane %v291_v2, %v1195_v1 }
 0x1a5   :  { %v288_v3 = vpop.xlane.xlu0 %287 }
 0x1a6   :  { %v325_v6 = vrot.slane %v288_v3, %v1195_v1 }
 0x1a7   :  { %v294_v9 = vpop.xlane.xlu1 %293 }
 0x1a8   :  { %v351_v10 = vsel %vm350_vm3, %v325_v6, %v321_v4  ;;  %v333_v8 = vrot.slane %v294_v9, %v1195_v1 }
 0x1a9   :  { %v353_v12 = vsel %vm352_vm4, %v329_v7, %v351_v10  ;;  %v297_v13 = vpop.xlane.xlu0 %296 }
 0x1aa   :  { %v355_v14 = vsel %vm354_vm5, %v333_v8, %v353_v12  ;;  %v337_v15 = vrot.slane %v297_v13, %v1195_v1 }
 0x1ab   :  { %v300_v17 = vpop.xlane.xlu1 %299 }
 0x1ac   :  { %v357_v18 = vsel %vm356_vm6, %v337_v15, %v355_v14  ;;  %v341_v19 = vrot.slane %v300_v17, %v1195_v1 }
 0x1ad   :  { %v1207_v20 = vpop.xlane.xlu0 %302 }
 0x1ae   :  { %v345_v22 = vrot.slane %v1207_v20, %v1195_v1  ;;  %v359_v23 = vsel %vm358_vm7, %v341_v19, %v357_v18 }
 0x1af   :  { %v1212_v24 = vpop.xlane.xlu1 %305 }
 0x1b0   :  { %v349_v25 = vrot.slane %v1212_v24, %v1195_v1  ;;  %v361_v28 = vsel %vm360_vm8, %v345_v22, %v359_v23 }
 0x1b2   :  { %v363_v29 = vsel %vm362_vm9, %v349_v25, %v361_v28 }
 0x1b3   :  { %v366_v30 = vsel %vm365_vm10, %v363_v29, -inf }
 0x1b4   :  { %367 = vmax.xlane.f32.xlu0 %v366_v30 }
 0x23d   :  { %v368_v34 = vpop.xlane.xlu0 %367 }
 0x23e   :  { %v369_v35 = vmax.f32 %v307_v32, %v368_v34 }
 0x240   :  { %v370_v36 = vsub.f32 %v307_v32, %v369_v35  ;;  %618 = vst.msk [vmem:[#allocation4] sm:$0xff] %vm171_vm2, %v369_v35  ;;  %375 = vperm.xlu1 %901, %v369_v35  }
 0x242   :  { %v371_v55 = vmul.f32 1.442695, %v370_v36 }
 0x2bb   :  { %v376_v40 = vpop.permute.xlu1 %375 }
 0x2bc   :  { %v380_v42 = vrot.slane %v376_v40, %v1148_v16  ;;  %v384_v43 = vrot.slane %v376_v40, %v383_v37  ;;  %v388_v44 = vrot.slane %v376_v40, %v387_v38  ;;  %v392_v49 = vrot.slane %v376_v40, %v391_v39 }
 0x2bd   :  { %v396_v57 = vrot.slane %v376_v40, %v395_v48  ;;  %v403_v16 = vsub.s32 6, %v1144_v11  ;;  %v400_v60 = vrot.slane %v376_v40, %v399_v56 }
 0x2be   :  { %v417_v45 = vsub.f32 %v285_v63, %v380_v42  ;;  %v418_v47 = vsub.f32 %v288_v3, %v384_v43  ;;  %v419_v51 = vsub.f32 %v291_v2, %v388_v44  ;;  %v420_v58 = vsub.f32 %v294_v9, %v392_v49 }
 0x2bf   :  { %v421_v61 = vsub.f32 %v297_v13, %v396_v57  ;;  %v407_v63 = vsub.s32 7, %v1144_v11  ;;  %v404_v2 = vrot.slane %v376_v40, %v403_v16  ;;  %v422_v3 = vsub.f32 %v300_v17, %v400_v60 }
 0x2c0   :  { %v425_v52 = vmul.f32 1.442695, %v417_v45  ;;  %v427_v53 = vmul.f32 1.442695, %v418_v47  ;;  %v429_v59 = vmul.f32 1.442695, %v419_v51 }
 0x2c1   :  { %v431_v62 = vmul.f32 1.442695, %v420_v58  ;;  %v433_v4 = vmul.f32 1.442695, %v421_v61  ;;  %v408_v7 = vrot.slane %v376_v40, %v407_v63  ;;  %v423_v10 = vsub.f32 %v1207_v20, %v404_v2 }
 0x2c2   :  { %904 = vpow2.f32 %v425_v52  ;;  %v435_v9 = vmul.f32 1.442695, %v422_v3 }
 0x2c3   :  { %906 = vpow2.f32 %v427_v53  ;;  %v424_v13 = vsub.f32 %v1212_v24, %v408_v7  ;;  %v437_v14 = vmul.f32 1.442695, %v423_v10 }
 0x2c4   :  { %908 = vpow2.f32 %v371_v55 }
 0x2c5   :  { %910 = vpow2.f32 %v429_v59  ;;  %v439_v15 = vmul.f32 1.442695, %v424_v13 }
 0x2c6   :  { %912 = vpow2.f32 %v431_v62 }
 0x2c7   :  { %914 = vpow2.f32 %v433_v4 }
 0x2c8   :  { %916 = vpow2.f32 %v435_v9 }
 0x2c9   :  { %918 = vpow2.f32 %v437_v14 }
 0x2ca   :  { %920 = vpow2.f32 %v439_v15 }
 0x2cf   :  { %v905_v6 = vpop.eup %904 }
 0x2d0   :  { %v907_v8 = vpop.eup %906  ;;  %452 = vperm.xlu0 %902, %v905_v6  }
 0x2d1   :  { %455 = vperm.xlu1 %901, %v907_v8   ;;  %v1229_v12 = vpop.eup %908 }
 0x2d2   :  { %v911_v11 = vpop.eup %910 }
 0x2d3   :  { %v913_v17 = vpop.eup %912 }
 0x2d4   :  { %524 = vperm.xlu0 %902, %v1229_v12   ;;  %v915_v18 = vpop.eup %914 }
 0x2d5   :  { %458 = vperm.xlu1 %901, %v911_v11   ;;  %v917_v19 = vpop.eup %916 }
 0x2d6   :  { %v919_v20 = vpop.eup %918 }
 0x2d7   :  { %v921_v22 = vpop.eup %920 }
 0x2d9   :  { %461 = vperm.xlu1 %901, %v913_v17  }
 0x2dd   :  { %464 = vperm.xlu1 %901, %v915_v18  }
 0x2e1   :  { %467 = vperm.xlu1 %901, %v917_v19  }
 0x2e5   :  { %470 = vperm.xlu1 %901, %v919_v20  }
 0x2e9   :  { %473 = vperm.xlu1 %901, %v921_v22  }
 0x34b   :  { %v453_v23 = vpop.permute.xlu0 %452 }
 0x34c   :  { %v456_v24 = vpop.permute.xlu1 %455  ;;  %v536_v25 = vmul.f32 %v453_v23, %v1150_v21 }
 0x34d   :  { %v537_v28 = vmul.f32 %v456_v24, %v1155_v27  ;;  %v482_v52 = vrot.slane %v456_v24, %v1195_v1 }
 0x34e   :  { %v544_v29 = vsel %vm96_vm0, %v536_v25, 0.0 }
 0x34f   :  { %v551_v32 = vsel %vm96_vm0, %v537_v28, 0.0  ;;  %v545_v34 = vrot.slane %v544_v29, 4 }
 0x350   :  { %v459_v30 = vpop.permute.xlu1 %458  ;;  %v552_v38 = vrot.slane %v551_v32, 4 }
 0x351   :  { %v538_v31 = vmul.f32 %v459_v30, %v1153_v26  ;;  %v546_v39 = vadd.f32 %v545_v34, %v544_v29  ;;  %v486_v56 = vrot.slane %v459_v30, %v1195_v1 }
 0x352   :  { %v553_v44 = vadd.f32 %v552_v38, %v551_v32 }
 0x353   :  { %v558_v35 = vsel %vm96_vm0, %v538_v31, 0.0  ;;  %v547_v45 = vrot.slane %v546_v39, 2 }
 0x354   :  { %v462_v36 = vpop.permute.xlu1 %461  ;;  %v559_v40 = vrot.slane %v558_v35, 4  ;;  %v554_v55 = vrot.slane %v553_v44, 2 }
 0x355   :  { %v539_v37 = vmul.f32 %v462_v36, %v1160_v33  ;;  %v478_v33 = vrot.slane %v453_v23, %v1195_v1  ;;  %v548_v58 = vadd.f32 %v547_v45, %v546_v39  ;;  %v490_v59 = vrot.slane %v462_v36, %v1195_v1 }
 0x356   :  { %v560_v26 = vadd.f32 %v559_v40, %v558_v35  ;;  %v555_v6 = vadd.f32 %v554_v55, %v553_v44 }
 0x357   :  { %v565_v21 = vsel %vm96_vm0, %v539_v37, 0.0  ;;  %v507_v2 = vsel %vm350_vm3, %v482_v52, %v478_v33  ;;  %v549_v8 = vrot.slane %v548_v58, 1  ;;  %v521_v33 = vld [vmem:[#allocation3] sm:$0xff] }
 0x358   :  { %v566_v42 = vrot.slane %v565_v21, 4  ;;  %v465_v27 = vpop.permute.xlu1 %464  ;;  %v508_v7 = vsel %vm352_vm4, %v486_v56, %v507_v2  ;;  %v556_v25 = vrot.slane %v555_v6, 1  ;;  %v638_v2 = vld [vmem:[#allocation14 + $0x10] sm:$0xff] }
 0x359   :  { %v540_v43 = vmul.f32 %v465_v27, %v1167_v41  ;;  %v561_v41 = vrot.slane %v560_v26, 2  ;;  %v494_v61 = vrot.slane %v465_v27, %v1195_v1  ;;  %v509_v14 = vsel %vm354_vm5, %v490_v59, %v508_v7  ;;  %v631_v7 = vld [vmem:[#allocation12] sm:$0xff] }
 0x35a   :  { %v567_v48 = vadd.f32 %v566_v42, %v565_v21  ;;  %v550_v38 = vadd.f32 %v549_v8, %v548_v58 }
 0x35b   :  { %v572_v47 = vsel %vm96_vm0, %v540_v43, 0.0  ;;  %v562_v13 = vadd.f32 %v561_v41, %v560_v26  ;;  %v510_v17 = vsel %vm356_vm6, %v494_v61, %v509_v14 }
 0x35c   :  { %v573_v49 = vrot.slane %v572_v47, 4  ;;  %v468_v51 = vpop.permute.xlu1 %467  ;;  %v568_v60 = vrot.slane %v567_v48, 2 }
 0x35d   :  { %v541_v53 = vmul.f32 %v468_v51, %v1172_v46  ;;  %v498_v46 = vrot.slane %v468_v51, %v1195_v1  ;;  %v563_v31 = vrot.slane %v562_v13, 1 }
 0x35e   :  { %v574_v57 = vadd.f32 %v573_v49, %v572_v47  ;;  %v569_v15 = vadd.f32 %v568_v60, %v567_v48 }
 0x35f   :  { %v579_v16 = vsel %vm96_vm0, %v541_v53, 0.0  ;;  %v511_v24 = vsel %vm358_vm7, %v498_v46, %v510_v17  ;;  %v564_v27 = vadd.f32 %v563_v31, %v562_v13  ;;  %v525_v53 = vpop.permute.xlu0 %524  ;;  %v637_v46 = vld [vmem:[#allocation14 + $0x8] sm:$0xff] }
 0x360   :  { %v580_v62 = vrot.slane %v579_v16, 4  ;;  %v471_v63 = vpop.permute.xlu1 %470  ;;  %v575_v3 = vrot.slane %v574_v57, 2  ;;  %v570_v35 = vrot.slane %v569_v15, 1  ;;  %v527_v59 = vmul.f32 %v525_v53, %v521_v33 }
 0x361   :  { %v542_v4 = vmul.f32 %v471_v63, %v1177_v50  ;;  %v502_v9 = vrot.slane %v471_v63, %v1195_v1  ;;  %v634_v63 = vld [vmem:[#allocation12 + $0x18] sm:$0xff] }
 0x362   :  { %v581_v10 = vadd.f32 %v580_v62, %v579_v16  ;;  %v576_v22 = vadd.f32 %v575_v3, %v574_v57  ;;  %v571_v43 = vadd.f32 %v570_v35, %v569_v15  ;;  %v639_v62 = vld [vmem:[#allocation14 + $0x18] sm:$0xff]  ;;  %878 = vmatpush3.xpose.msk.msra.mxu0 %vm96_vm0, %v634_v63  ;;  %v633_v3 = vld [vmem:[#allocation12 + $0x10] sm:$0xff] }
 0x363   :  { %v586_v11 = vsel %vm96_vm0, %v542_v4, 0.0  ;;  %v512_v30 = vsel %vm360_vm8, %v502_v9, %v511_v24  ;;  %867 = vmatpush3.xpose.msk.msra.mxu1 %vm96_vm0, %v639_v62  ;;  %879 = vmatprep.subr.mxu0 %v1061_v0  ;;  %v632_v4 = vld [vmem:[#allocation12 + $0x8] sm:$0xff] }
 0x364   :  { %v582_v18 = vrot.slane %v581_v10, 2  ;;  %v587_v19 = vrot.slane %v586_v11, 4  ;;  %v474_v20 = vpop.permute.xlu1 %473  ;;  %v577_v39 = vrot.slane %v576_v22, 1  ;;  %868 = vmatprep.subr.mxu1 %v1061_v0 }
 0x365   :  { %v506_v50 = vrot.slane %v474_v20, %v1195_v1  ;;  %v543_v23 = vmul.f32 %v474_v20, %v1182_v54  ;;  %v557_v54 = vadd.f32 %v556_v25, %v555_v6  ;;  %v636_v6 = vld [vmem:[#allocation14] sm:$0xff] }
 0x366   :  { %v583_v28 = vadd.f32 %v582_v18, %v581_v10  ;;  %v588_v29 = vadd.f32 %v587_v19, %v586_v11  ;;  %v578_v26 = vadd.f32 %v577_v39, %v576_v22  ;;  %880 = vmatpush3.xpose.msk.msra.mxu0 %vm96_vm0, %v633_v3  ;;  %v441_v10 = vld [vmem:[#allocation5] sm:$0xff] }
 0x367   :  { %v593_v32 = vsel %vm96_vm0, %v543_v23, 0.0  ;;  %v513_v34 = vsel %vm362_vm9, %v506_v50, %v512_v30  ;;  %v608_v47 = vsel %vm350_vm3, %v557_v54, %v550_v38  ;;  %869 = vmatpush3.xpose.msk.msra.mxu1 %vm96_vm0, %v638_v2  ;;  %881 = vmatprep.subr.mxu0 %v1061_v0  ;;  %v442_v9 = vmul.f32 %v1229_v12, %v441_v10 }
 0x368   :  { %v589_v36 = vrot.slane %v588_v29, 2  ;;  %v594_v37 = vrot.slane %v593_v32, 4  ;;  %v515_v1 = vsel %vm365_vm10, %v513_v34, 0.0  ;;  %v584_v40 = vrot.slane %v583_v28, 1  ;;  %870 = vmatprep.subr.mxu1 %v1061_v0 }
 0x369   :  { %516 = vadd.xlane.f32.xlu1 %v515_v1  ;;  %v609_v51 = vsel %vm352_vm4, %v564_v27, %v608_v47 }
 0x36a   :  { %v590_v21 = vadd.f32 %v589_v36, %v588_v29  ;;  %v595_v42 = vadd.f32 %v594_v37, %v593_v32  ;;  %v585_v48 = vadd.f32 %v584_v40, %v583_v28  ;;  %v610_v55 = vsel %vm354_vm5, %v571_v43, %v609_v51  ;;  %882 = vmatpush3.xpose.msk.msra.mxu0 %vm96_vm0, %v632_v4 }
 0x36b   :  { %v611_v57 = vsel %vm356_vm6, %v578_v26, %v610_v55  ;;  %871 = vmatpush3.xpose.msk.msra.mxu1 %vm96_vm0, %v637_v46  ;;  %883 = vmatprep.subr.mxu0 %v1061_v0 }
 0x36c   :  { %v591_v44 = vrot.slane %v590_v21, 1  ;;  %v596_v45 = vrot.slane %v595_v42, 2  ;;  %v612_v58 = vsel %vm358_vm7, %v585_v48, %v611_v57  ;;  %872 = vmatprep.subr.mxu1 %v1061_v0 }
 0x36e   :  { %v597_v49 = vadd.f32 %v596_v45, %v595_v42  ;;  %v592_v52 = vadd.f32 %v591_v44, %v590_v21  ;;  %884 = vmatpush3.xpose.msk.msra.mxu0 %vm96_vm0, %v631_v7 }
 0x36f   :  { %873 = vmatpush3.xpose.msk.msra.mxu1 %vm96_vm0, %v636_v6 }
 0x370   :  { %v598_v56 = vrot.slane %v597_v49, 1  ;;  %v613_v16 = vsel %vm360_vm8, %v592_v52, %v612_v58 }
 0x372   :  { %v599_v41 = vadd.f32 %v598_v56, %v597_v49  ;;  %875 = vmatmul.mubr.msk.f32.vlgmr.msra.gmra.mxu1 %vm96_vm0, %v1134_v5 }
 0x374   :  { %v614_v60 = vsel %vm362_vm9, %v599_v41, %v613_v16 }
 0x375   :  { %v616_v61 = vadd.f32 %v614_v60, %v527_v59 }
 0x377   :  { %617 = vst.msk [vmem:[#allocation3] sm:$0xff] %vm96_vm0, %v616_v61 }
 0x37e   :  { %v624_v17 = vld [vmem:[#allocation3] sm:$0xff] }
 0x3f2   :  { %v517_v8 = vpop.xlane.xlu1 %516 }
 0x3f3   :  { %v518_v13 = vadd.f32 %v517_v8, %v442_v9 }
 0x3f5   :  { %520 = vst.msk [vmem:[#allocation5] sm:$0xff] %vm171_vm2, %v518_v13 }
 0x3fc   :  { %v622_v14 = vld [vmem:[#allocation5] sm:$0xff] }
 0x3fd   :  { %922 = vrcp.f32 %v622_v14 }
 0x40a   :  { %v923_v11 = vpop.eup %922 }
 0x40b   :  { %627 = vperm.xlu0 %902, %v923_v11  }
 0x432   :  { %v721_v0 = vpop.f32.mrf.mxu1 }
 0x434   :  { %v876_v15 = vpop.f32.mrf.mxu1 }
 0x486   :  { %v628_v18 = vpop.permute.xlu0 %627 }
 0x487   :  { %v630_v19 = vmul.f32 %v628_v18, %v624_v17 }
 0x489   :  { %886 = vmatmul.mubr.msk.f32.vlgmr.msra.gmra.mxu0 %vm96_vm0, %v630_v19 }
 0x549   :  { %v806_v20 = vpop.f32.mrf.mxu0 }
 0x54a   :  { %v807_v5 = vadd.f32 %v806_v20, %v721_v0 }
 0x54b   :  { %v887_v22 = vpop.f32.mrf.mxu0 }
 0x54c   :  { %924 = vtanh.f32 %v807_v5 }
 0x559   :  { %v925_v12 = vpop.eup %924 }
 0x55a   :  { %811 = vst.msk [vmem:[#allocation15] sm:$0xff] %vm96_vm0, %v925_v12 }
 0x55b   :  { %1037 = shalt.err (!%p1034_p1)
}
 0x55c   :  { %821 = dma.vmem_to_hbm [thread:$0]  %s819_s4, 128, %s1301_s5, [#allocation8]  }
 0x55d   :  { %1052 = dma.done.wait [#allocation8], 128  }
 0x55e   :  { %1053 = vsyncadd [#allocation8], 4294967168 }
 0x55f   :  { %825 = vsyncpa [#allocation7], 1 }
 0x560   :  { %826 = vsyncpa [#allocation10], 1 }
 0x561   :  { %827 = vsyncpa [#allocation13], 1 }
 0x562   :  { %828 = vsyncpa [#allocation8], 1 }

</bundles_post_ra>
